<compile_context>
chip_gen: v6e
topology: v6e:2x2x1
jax: 0.10.0
libtpu: 0.0.40
codegen_flags: <defaults>
</compile_context>

<pallas_src>
import math
from functools import partial

import jax
import jax.numpy as jnp
from jax.experimental import pallas as pl
from jax.experimental.pallas import tpu as pltpu


def _round_up(x, m):
    return ((x + m - 1) // m) * m


# ----------------------------------------------------------------------------
# Prologue kernel: fused two-head projection + ReLU, dual-dtype output.
# ----------------------------------------------------------------------------
def _proj_relu_kernel(x_ref, w_ref, b_ref, o32_ref, ocd_ref, *, compute_dtype):
    x = x_ref[...].astype(compute_dtype)
    w = w_ref[...].astype(compute_dtype)
    y = jnp.dot(x, w, preferred_element_type=jnp.float32) + b_ref[...]
    y = jnp.maximum(y, 0.0)
    o32_ref[...] = y                                   # f32: residual / query side
    ocd_ref[...] = y.astype(ocd_ref.dtype)             # compute dtype: key side


def project_relu(x, w, b, *, compute_dtype, block_rows=512):
    n, h = x.shape
    d2 = w.shape[1]
    block_rows = _round_up(min(block_rows, _round_up(n, 8)), 8)
    n_p = _round_up(n, block_rows)
    x_p = jnp.pad(x, ((0, n_p - n), (0, 0))) if n_p != n else x

    out32, outcd = pl.pallas_call(
        partial(_proj_relu_kernel, compute_dtype=compute_dtype),
        out_shape=(jax.ShapeDtypeStruct((n_p, d2), jnp.float32),
                   jax.ShapeDtypeStruct((n_p, d2), compute_dtype)),
        grid_spec=pltpu.PrefetchScalarGridSpec(
            num_scalar_prefetch=0,
            grid=(n_p // block_rows,),
            in_specs=[
                pl.BlockSpec((block_rows, h), lambda i: (i, 0)),
                pl.BlockSpec((h, d2),         lambda i: (0, 0)),
                pl.BlockSpec((1, d2),         lambda i: (0, 0)),
            ],
            out_specs=[
                pl.BlockSpec((block_rows, d2), lambda i: (i, 0)),
                pl.BlockSpec((block_rows, d2), lambda i: (i, 0)),
            ]),
        compiler_params=pltpu.CompilerParams(dimension_semantics=("parallel",)),
    )(x_p, w, b)
    return out32[:n], outcd[:n]


# ----------------------------------------------------------------------------
# Attention kernel: masked scaled-dot-product with online softmax + residual.
# Inputs are pre-projected (q: f32, k: compute dtype); scale is folded into a
# resident scaled-q copy; padded key columns are removed by a finalize-time
# denominator correction instead of a per-element mask.
# ----------------------------------------------------------------------------
def _gat_attention_kernel(
    q_ref, k_ref, adj_ref,             # (bq, d2) f32 | (bk, d2) cd | (bq, bk) int8
    o_ref,                             # (bq, d2) output tile
    qs_sc, m_sc, l_sc, acc_sc,         # VMEM scratch, persist across key tiles
    *, scale, n_pad, compute_dtype, approx_recip):
    ki = pl.program_id(1)

    @pl.when(ki == 0)
    def _init():
        # Pre-scaled compute-dtype copy of the projected q tile (scale folded in
        # once; the unscaled q_ref is kept for the residual add).
        qs_sc[...] = (q_ref[...] * scale).astype(compute_dtype)
        m_sc[...] = jnp.full_like(m_sc, -jnp.inf)
        l_sc[...] = jnp.zeros_like(l_sc)
        acc_sc[...] = jnp.zeros_like(acc_sc)

    k = k_ref[...]                                     # already compute dtype

    # scores = adj * (q_scaled @ k^T); contract last dims directly (no k.T
    # relayout). Padded key rows are exactly zero -> their score is exactly 0.
    s = jax.lax.dot_general(
        qs_sc[...], k, (((1,), (1,)), ((), ())),
        preferred_element_type=jnp.float32)
    s = s * adj_ref[...].astype(jnp.float32)

    # Online-softmax update (f32 state).
    m_prev = m_sc[...]
    m_new = jnp.maximum(m_prev, jnp.max(s, axis=1, keepdims=True))
    alpha = jnp.exp(m_prev - m_new)
    p = jnp.exp(s - m_new)
    l_sc[...] = alpha * l_sc[...] + jnp.sum(p, axis=1, keepdims=True)
    acc_sc[...] = alpha * acc_sc[...] + jnp.dot(
        p.astype(compute_dtype), k, preferred_element_type=jnp.float32)
    m_sc[...] = m_new
    # TODO(synk): optional bf16 exp on v6e/v7x (EUP bf16) -- kept in f32 so the
    # row-sum accumulates in f32 without an extra per-element cast.

    @pl.when(ki == pl.num_programs(1) - 1)
    def _finalize():
        l = l_sc[...]
        if n_pad:  # trace-time constant
            # Padded key columns have score exactly 0 (zero projected-K rows,
            # zero adjacency), so they contributed exactly n_pad*exp(-m) to l
            # and 0 to acc. Remove them here instead of masking per element.
            # ReLU features => real scores >= 0 => real part of l >= 1, so the
            # subtraction is well-conditioned.
            l = l - n_pad * jnp.exp(-m_sc[...])
        if approx_recip:
            inv_l = pl.reciprocal(l, approx=True)      # EUP slot, ~free
        else:
            inv_l = 1.0 / l
        # Residual add of the (unscaled) projected query (== `+ user` in the
        # reference after `user` was reassigned to the concatenated heads).
        o_ref[...] = (acc_sc[...] * inv_l + q_ref[...]).astype(o_ref.dtype)
        # TODO(synk): the (bq, 32) output is only 32 lanes wide (masked partial
        # stores); packing 4 q-row groups into a 128-lane slab would need an
        # in-kernel relayout and is left as a wrapper-side option.


# ----------------------------------------------------------------------------
# Wrapper: tiling, padding, VMEM sizing, pallas_call plumbing per direction.
# ----------------------------------------------------------------------------
def fused_gat_attention(q_proj_f32, k_proj_cd, adj, *, hidden_dim,
                        block_q=512, block_k=2048,
                        compute_dtype=jnp.bfloat16, approx_recip=True):
    nq, d2 = q_proj_f32.shape
    nk, _ = k_proj_cd.shape
    assert adj.shape == (nq, nk)

    # Keep the 'parallel' q axis >= 2 tiles when possible (v7x: 2 TensorCores).
    if nq > 32:
        block_q = min(block_q, _round_up(math.ceil(nq / 2), 32))
    # 32-row granularity on q (int8 adjacency packs 4 rows/sublane), 128-lane
    # granularity on the key axis.
    block_q = _round_up(min(block_q, _round_up(nq, 32)), 32)
    block_k = _round_up(min(block_k, _round_up(nk, 128)), 128)
    nq_p = _round_up(nq, block_q)
    nk_p = _round_up(nk, block_k)
    n_pad = nk_p - nk

    q_p = jnp.pad(q_proj_f32, ((0, nq_p - nq), (0, 0))) if nq_p != nq else q_proj_f32
    k_p = jnp.pad(k_proj_cd, ((0, nk_p - nk), (0, 0))) if nk_p != nk else k_proj_cd
    adj_p = (jnp.pad(adj, ((0, nq_p - nq), (0, nk_p - nk)))
             if (nq_p, nk_p) != (nq, nk) else adj)

    # VMEM footprint: double-buffered inputs/outputs + scratch + f32 score
    # temporaries (the real ceiling at large tiles). Capped at 64 MiB (v7x).
    cd_bytes = jnp.dtype(compute_dtype).itemsize
    adj_bytes = jnp.dtype(adj_p.dtype).itemsize
    est = (2 * (block_q * d2 * 4 + block_k * d2 * cd_bytes
                + block_q * block_k * adj_bytes)
           + 2 * block_q * d2 * 4
           + block_q * d2 * cd_bytes + 2 * block_q * 4 + block_q * d2 * 4
           + 6 * block_q * block_k * 4)
    vmem_limit = int(min(max(est + (4 << 20), 16 << 20), 64 << 20))

    grid = (nq_p // block_q, nk_p // block_k)   # (parallel rows, arbitrary keys)
    kernel = partial(
        _gat_attention_kernel,
        scale=1.0 / math.sqrt(hidden_dim),
        n_pad=int(n_pad),
        compute_dtype=compute_dtype, approx_recip=approx_recip)

    out_p = pl.pallas_call(
        kernel,
        out_shape=jax.ShapeDtypeStruct((nq_p, d2), jnp.float32),
        grid_spec=pltpu.PrefetchScalarGridSpec(
            num_scalar_prefetch=0,
            grid=grid,
            in_specs=[
                pl.BlockSpec((block_q, d2), lambda qi, ki: (qi, 0)),        # q (f32)
                pl.BlockSpec((block_k, d2), lambda qi, ki: (ki, 0)),        # k (cd)
                pl.BlockSpec((block_q, block_k), lambda qi, ki: (qi, ki)),  # adj int8
            ],
            out_specs=pl.BlockSpec((block_q, d2), lambda qi, ki: (qi, 0)),
            scratch_shapes=[
                pltpu.VMEM((block_q, d2), compute_dtype),   # scaled q copy
                pltpu.VMEM((block_q, 1), jnp.float32),      # running max m
                pltpu.VMEM((block_q, 1), jnp.float32),      # running denom l
                pltpu.VMEM((block_q, d2), jnp.float32),     # output accumulator
            ]),
        compiler_params=pltpu.CompilerParams(
            dimension_semantics=("parallel", "arbitrary"),
            vmem_limit_bytes=vmem_limit),
    )(q_p, k_p, adj_p)

    return out_p[:nq]


# ----------------------------------------------------------------------------
# Full forward (Attention.forward / GAT.forward in eval mode)
# ----------------------------------------------------------------------------
def attention_forward(params, user, item, UV_adj, VU_adj, hidden_dim,
                      block_q=512, block_k=2048,
                      compute_dtype=jnp.bfloat16, approx_recip=True):
    # Fuse the two H -> H/2 heads into a single H -> H matmul per side.
    wu = jnp.concatenate([params["u_head1_w"], params["u_head2_w"]], axis=1)
    bu = jnp.concatenate([params["u_head1_b"], params["u_head2_b"]], axis=1)
    wv = jnp.concatenate([params["v_head1_w"], params["v_head2_w"]], axis=1)
    bv = jnp.concatenate([params["v_head1_b"], params["v_head2_b"]], axis=1)

    # Project each side ONCE (dual-dtype output): f32 for the query/residual
    # role, compute dtype for the key role (halves repeated key HBM traffic).
    u32, ucd = project_relu(user, wu, bu, compute_dtype=compute_dtype)
    v32, vcd = project_relu(item, wv, bv, compute_dtype=compute_dtype)

    kwargs = dict(hidden_dim=hidden_dim, block_q=block_q, block_k=block_k,
                  compute_dtype=compute_dtype, approx_recip=approx_recip)
    learn_user = fused_gat_attention(u32, vcd, UV_adj, **kwargs)
    learn_item = fused_gat_attention(v32, ucd, VU_adj, **kwargs)
    return learn_user, learn_item


def gat_forward(params, ufea, vfea, UV_adj, VU_adj, hidden_dim, **kwargs):
    # GAT.forward: dropout is identity in eval mode; LeakyReLU is unused.
    # TODO(synk): training-mode dropout (random masking) not implemented.
    return attention_forward(params, ufea, vfea, UV_adj, VU_adj, hidden_dim, **kwargs)


# Pure-JAX reference (same math, no Pallas) for correctness checking.
def reference_forward(params, user, item, UV_adj, VU_adj, hidden_dim):
    def head(x, w, b):
        return jnp.maximum(x @ w + b, 0.0)

    u = jnp.concatenate(
        [head(user, params["u_head1_w"], params["u_head1_b"]),
         head(user, params["u_head2_w"], params["u_head2_b"])], axis=1)
    v = jnp.concatenate(
        [head(item, params["v_head1_w"], params["v_head1_b"]),
         head(item, params["v_head2_w"], params["v_head2_b"])], axis=1)

    def attn(q, k, adj):
        s = adj.astype(jnp.float32) * (q @ k.T) / math.sqrt(hidden_dim)
        p = jax.nn.softmax(s, axis=1)
        return p @ k + q

    return attn(u, v, UV_adj), attn(v, u, VU_adj)


if __name__ == "__main__":
    hidden_dim = 32
    divide = hidden_dim // 2
    Nu, Nv = 96, 160   # small, but multi-tile with block_q=32 / block_k=128

    key = jax.random.PRNGKey(0)
    keys = jax.random.split(key, 16)

    def lin_init(kw, kb, fan_in, fan_out):
        bound = 1.0 / math.sqrt(fan_in)
        w = jax.random.uniform(kw, (fan_in, fan_out), jnp.float32, -bound, bound)
        b = jax.random.uniform(kb, (1, fan_out), jnp.float32, -bound, bound)
        return w, b

    params = {}
    params["u_head1_w"], params["u_head1_b"] = lin_init(keys[0], keys[1], hidden_dim, divide)
    params["u_head2_w"], params["u_head2_b"] = lin_init(keys[2], keys[3], hidden_dim, divide)
    params["v_head1_w"], params["v_head1_b"] = lin_init(keys[4], keys[5], hidden_dim, divide)
    params["v_head2_w"], params["v_head2_b"] = lin_init(keys[6], keys[7], hidden_dim, divide)
    # Present in __init__ but unused in forward() (kept for shape fidelity):
    params["lin_u_w"], params["lin_u_b"] = lin_init(keys[8], keys[9], hidden_dim, hidden_dim)
    params["lin_v_w"], params["lin_v_b"] = lin_init(keys[10], keys[11], hidden_dim, hidden_dim)

    user = jax.random.normal(keys[12], (Nu, hidden_dim), jnp.float32)
    item = jax.random.normal(keys[13], (Nv, hidden_dim), jnp.float32)
    # Adjacency shipped as int8 (4x less HBM traffic on the O(N^2) tensor).
    UV_adj = jax.random.bernoulli(keys[14], 0.4, (Nu, Nv)).astype(jnp.int8)
    VU_adj = jax.random.bernoulli(keys[15], 0.4, (Nv, Nu)).astype(jnp.int8)

    ref_user, ref_item = reference_forward(params, user, item, UV_adj, VU_adj, hidden_dim)

    # f32 exact path with tiny tiles: exercises multi-tile q/k axes, the online
    # softmax, and the padded-column denominator correction.
    lu32, li32 = attention_forward(params, user, item, UV_adj, VU_adj, hidden_dim,
                                   block_q=32, block_k=128,
                                   compute_dtype=jnp.float32, approx_recip=False)
    jax.block_until_ready((lu32, li32))
    assert lu32.shape == (Nu, hidden_dim) and li32.shape == (Nv, hidden_dim)
    assert jnp.allclose(lu32, ref_user, atol=1e-4, rtol=1e-4)
    assert jnp.allclose(li32, ref_item, atol=1e-4, rtol=1e-4)

    # Production-default path (large tiles, bf16 MXU, approx reciprocal).
    lu16, li16 = attention_forward(params, user, item, UV_adj, VU_adj, hidden_dim)
    jax.block_until_ready((lu16, li16))
    assert jnp.allclose(lu16, ref_user, atol=3e-2, rtol=3e-2)
    assert jnp.allclose(li16, ref_item, atol=3e-2, rtol=3e-2)

    print("KERNEL_OK")
</pallas_src>

<mosaic_0001>
module attributes {stable_mosaic.version = 11 : i64} {
  func.func @_proj_relu_kernel(%arg0: i32, %arg1: memref<96x32xf32, #tpu.memory_space<vmem>>, %arg2: memref<32x32xf32, #tpu.memory_space<vmem>>, %arg3: memref<1x32xf32, #tpu.memory_space<vmem>>, %arg4: memref<96x32xf32, #tpu.memory_space<vmem>>, %arg5: memref<96x32xf32, #tpu.memory_space<vmem>>) attributes {dimension_semantics = [#tpu.dimension_semantics<parallel>], iteration_bounds = array<i64: 1>, scalar_prefetch = 0 : i64, scratch_operands = 0 : i64, tpu.core_type = #tpu.core_type<tc>, window_params = [{transform_indices = @transform_0, window_bounds = array<i64: 96, 32>}, {pipeline_mode = #tpu.pipeline_mode<synchronous>, transform_indices = @transform_1, window_bounds = array<i64: 32, 32>}, {pipeline_mode = #tpu.pipeline_mode<synchronous>, transform_indices = @transform_2, window_bounds = array<i64: 1, 32>}, {transform_indices = @transform_3, window_bounds = array<i64: 96, 32>}, {transform_indices = @transform_4, window_bounds = array<i64: 96, 32>}]} {
    %c0 = arith.constant 0 : index
    %c0_0 = arith.constant 0 : index
    %0 = vector.load %arg1[%c0, %c0_0] : memref<96x32xf32, #tpu.memory_space<vmem>>, vector<96x32xf32>
    %c0_1 = arith.constant 0 : index
    %c0_2 = arith.constant 0 : index
    %1 = vector.load %arg2[%c0_1, %c0_2] : memref<32x32xf32, #tpu.memory_space<vmem>>, vector<32x32xf32>
    %cst = arith.constant dense<0.000000e+00> : vector<96x32xf32>
    %2 = tpu.matmul %0, %1, %cst {dimension_numbers = #tpu.dot_dimension_numbers<[1], [0], [0], [1], [0, 0, 1, 1], [], []>} : vector<96x32xf32>, vector<32x32xf32>, vector<96x32xf32> -> vector<96x32xf32>
    %c0_3 = arith.constant 0 : index
    %c0_4 = arith.constant 0 : index
    %3 = vector.load %arg3[%c0_3, %c0_4] : memref<1x32xf32, #tpu.memory_space<vmem>>, vector<1x32xf32>
    %4 = vector.broadcast %3 : vector<1x32xf32> to vector<96x32xf32>
    %5 = arith.addf %2, %4 : vector<96x32xf32>
    %cst_5 = arith.constant 0.000000e+00 : f32
    %6 = vector.broadcast %cst_5 : f32 to vector<96x32xf32>
    %7 = arith.maximumf %5, %6 : vector<96x32xf32>
    %c0_6 = arith.constant 0 : index
    %c0_7 = arith.constant 0 : index
    %8 = vector.load %arg4[%c0_6, %c0_7] : memref<96x32xf32, #tpu.memory_space<vmem>>, vector<96x32xf32>
    tpu.vector_store %arg4[%c0_6, %c0_7], %7 {strides = array<i32>} : memref<96x32xf32, #tpu.memory_space<vmem>>, vector<96x32xf32>,
    %c0_8 = arith.constant 0 : index
    %c0_9 = arith.constant 0 : index
    %9 = vector.load %arg5[%c0_8, %c0_9] : memref<96x32xf32, #tpu.memory_space<vmem>>, vector<96x32xf32>
    tpu.vector_store %arg5[%c0_8, %c0_9], %7 {strides = array<i32>} : memref<96x32xf32, #tpu.memory_space<vmem>>, vector<96x32xf32>,
    return
  }
  func.func @transform_0(%arg0: i32) -> (i32, i32) {
    %c0_i32 = arith.constant 0 : i32
    %c0_i32_0 = arith.constant 0 : i32
    return %arg0, %c0_i32 : i32, i32
  }
  func.func @transform_1(%arg0: i32) -> (i32, i32) {
    %c0_i32 = arith.constant 0 : i32
    %c0_i32_0 = arith.constant 0 : i32
    %c0_i32_1 = arith.constant 0 : i32
    return %c0_i32, %c0_i32_0 : i32, i32
  }
  func.func @transform_2(%arg0: i32) -> (i32, i32) {
    %c0_i32 = arith.constant 0 : i32
    %c0_i32_0 = arith.constant 0 : i32
    %c0_i32_1 = arith.constant 0 : i32
    return %c0_i32, %c0_i32_0 : i32, i32
  }
  func.func @transform_3(%arg0: i32) -> (i32, i32) {
    %c0_i32 = arith.constant 0 : i32
    %c0_i32_0 = arith.constant 0 : i32
    return %arg0, %c0_i32 : i32, i32
  }
  func.func @transform_4(%arg0: i32) -> (i32, i32) {
    %c0_i32 = arith.constant 0 : i32
    %c0_i32_0 = arith.constant 0 : i32
    return %arg0, %c0_i32 : i32, i32
  }
}

</mosaic_0001>

<bundles_post_ra>
// kernel: tpu_custom_call.1
= control target key start
LH: loop header
LB: loop body
LE: loop exit
PB: predicated region body
PF: predicated region fallthrough
CT: control target
= control target key end

     0   :  { %vm39_vm0 = vcmask 261120   ;;  %s492_s1 = inlined_call_operand.vmem [shape: f32[32,32], index: 1, kind: input, shape index: {}]   ;;  %s493_s0 = inlined_call_operand.vmem [shape: f32[96,32], index: 0, kind: input, shape index: {}]   ;;  %s494_s2 = inlined_call_operand.vmem [shape: f32[1,32], index: 2, kind: input, shape index: {}]   ;;  %s495_s3 = inlined_call_operand.vmem [shape: f32[96,32], index: 3, kind: output, shape index: {0}]   ;;  %s496_s4 = inlined_call_operand.vmem [shape: f32[96,32], index: 4, kind: output, shape index: {1}]  }
   0x1   :  { %v31_v0 = vld [vmem:[%s492_s1 + $0x18] sm:$0xff]  ;;  %v30_v1 = vld [vmem:[%s492_s1 + $0x10] sm:$0xff]  ;;  %v29_v2 = vld [vmem:[%s492_s1 + $0x8] sm:$0xff] }
   0x2   :  { %274 = vmatprep.subr.mxu0 %v31_v0  ;;  %300 = vmatprep.subr.mxu1 %v31_v0  ;;  %v28_v3 = vld [vmem:[%s492_s1] sm:$0xff]  ;;  %v22_v5 = vld [vmem:[%s493_s0 + $0x30] sm:$0xff]  ;;  %v17_v6 = vld [vmem:[%s493_s0 + $0x8] sm:$0xff] }
   0x3   :  { %275 = vmatpush3.msra.mxu0 %v31_v0  ;;  %304 = vmatpush3.msra.mxu1 %v31_v0  ;;  %v16_v4 = vld [vmem:[%s493_s0] sm:$0xff]  ;;  %v23_v7 = vld [vmem:[%s493_s0 + $0x38] sm:$0xff]  ;;  %v18_v8 = vld [vmem:[%s493_s0 + $0x10] sm:$0xff] }
   0x4   :  { %276 = vmatprep.subr.mxu0 %v30_v1  ;;  %301 = vmatprep.subr.mxu1 %v30_v1  ;;  %v24_v9 = vld [vmem:[%s493_s0 + $0x40] sm:$0xff]  ;;  %v19_v10 = vld [vmem:[%s493_s0 + $0x18] sm:$0xff]  ;;  %v25_v11 = vld [vmem:[%s493_s0 + $0x48] sm:$0xff] }
   0x5   :  { %277 = vmatpush3.msra.mxu0 %v30_v1  ;;  %305 = vmatpush3.msra.mxu1 %v30_v1  ;;  %v20_v12 = vld [vmem:[%s493_s0 + $0x20] sm:$0xff]  ;;  %v26_v13 = vld [vmem:[%s493_s0 + $0x50] sm:$0xff]  ;;  %v21_v14 = vld [vmem:[%s493_s0 + $0x28] sm:$0xff] }
   0x6   :  { %278 = vmatprep.subr.mxu0 %v29_v2  ;;  %302 = vmatprep.subr.mxu1 %v29_v2  ;;  %v27_v15 = vld [vmem:[%s493_s0 + $0x58] sm:$0xff]  ;;  %v245_v16 = vld [vmem:[%s494_s2] ss:$0 sm:$0xff] }
   0x7   :  { %279 = vmatpush3.msra.mxu0 %v29_v2  ;;  %306 = vmatpush3.msra.mxu1 %v29_v2 }
   0x8   :  { %280 = vmatprep.subr.mxu0 %v28_v3  ;;  %303 = vmatprep.subr.mxu1 %v28_v3 }
   0x9   :  { %281 = vmatpush3.msra.mxu0 %v28_v3  ;;  %307 = vmatpush3.msra.mxu1 %v28_v3 }
   0xa   :  { %282 = vmatprep.mubr.msk.f32.mxu0 %vm39_vm0, %v16_v4  ;;  %291 = vmatprep.mubr.msk.f32.mxu1 %vm39_vm0, %v22_v5 }
   0xb   :  { %283 = vmatmul.mubr.msk.f32.vlgmr.msra.gmra.mxu0 %vm39_vm0, %v17_v6  ;;  %292 = vmatmul.mubr.msk.f32.vlgmr.msra.gmra.mxu1 %vm39_vm0, %v23_v7 }
   0xc   :  { %285 = vmatprep.mubr.msk.f32.mxu0 %vm39_vm0, %v18_v8  ;;  %294 = vmatprep.mubr.msk.f32.mxu1 %vm39_vm0, %v24_v9 }
   0xf   :  { %286 = vmatmul.mubr.msk.f32.gmra.mxu0 %vm39_vm0, %v19_v10  ;;  %295 = vmatmul.mubr.msk.f32.gmra.mxu1 %vm39_vm0, %v25_v11 }
  0x10   :  { %288 = vmatprep.mubr.msk.f32.mxu0 %vm39_vm0, %v20_v12  ;;  %297 = vmatprep.mubr.msk.f32.mxu1 %vm39_vm0, %v26_v13 }
  0x13   :  { %289 = vmatmul.mubr.msk.f32.gmra.mxu0 %vm39_vm0, %v21_v14  ;;  %298 = vmatmul.mubr.msk.f32.gmra.mxu1 %vm39_vm0, %v27_v15 }
  0xcb   :  { %v284_v17 = vpop.f32.mrf.mxu0  ;;  %v293_v18 = vpop.f32.mrf.mxu1 }
  0xcc   :  { %v148_v19 = vadd.f32 %v284_v17, %v245_v16  ;;  %v178_v20 = vadd.f32 %v293_v18, %v245_v16 }
  0xcd   :  { %v142_v21 = vpop.f32.mrf.mxu0  ;;  %v172_v22 = vpop.f32.mrf.mxu1 }
  0xce   :  { %v202_v23 = vmax.f32 %v148_v19, 0.0  ;;  %v208_v24 = vmax.f32 %v178_v20, 0.0  ;;  %v143_v25 = vadd.f32 %v245_v16, %v142_v21  ;;  %v173_v26 = vadd.f32 %v245_v16, %v172_v22 }
  0xcf   :  { %v287_v27 = vpop.f32.mrf.mxu0  ;;  %v296_v28 = vpop.f32.mrf.mxu1 }
  0xd0   :  { %214 = vst.msk [vmem:[%s495_s3 + $0x8] sm:$0xff] %vm39_vm0, %v202_v23  ;;  %226 = vst.msk [vmem:[%s496_s4 + $0x8] sm:$0xff] %vm39_vm0, %v202_v23  ;;  %v201_v29 = vmax.f32 %v143_v25, 0.0  ;;  %v207_v30 = vmax.f32 %v173_v26, 0.0  ;;  %v158_v31 = vadd.f32 %v287_v27, %v245_v16  ;;  %v188_v32 = vadd.f32 %v296_v28, %v245_v16 }
  0xd1   :  { %220 = vst.msk [vmem:[%s495_s3 + $0x38] sm:$0xff] %vm39_vm0, %v208_v24  ;;  %232 = vst.msk [vmem:[%s496_s4 + $0x38] sm:$0xff] %vm39_vm0, %v208_v24  ;;  %v152_v33 = vpop.f32.mrf.mxu0  ;;  %v182_v34 = vpop.f32.mrf.mxu1 }
  0xd2   :  { %213 = vst.msk [vmem:[%s495_s3] sm:$0xff] %vm39_vm0, %v201_v29  ;;  %225 = vst.msk [vmem:[%s496_s4] sm:$0xff] %vm39_vm0, %v201_v29  ;;  %v204_v35 = vmax.f32 %v158_v31, 0.0  ;;  %v210_v36 = vmax.f32 %v188_v32, 0.0  ;;  %v153_v37 = vadd.f32 %v245_v16, %v152_v33  ;;  %v183_v38 = vadd.f32 %v245_v16, %v182_v34 }
  0xd3   :  { %219 = vst.msk [vmem:[%s495_s3 + $0x30] sm:$0xff] %vm39_vm0, %v207_v30  ;;  %231 = vst.msk [vmem:[%s496_s4 + $0x30] sm:$0xff] %vm39_vm0, %v207_v30  ;;  %v290_v39 = vpop.f32.mrf.mxu0  ;;  %v299_v40 = vpop.f32.mrf.mxu1 }
  0xd4   :  { %216 = vst.msk [vmem:[%s495_s3 + $0x18] sm:$0xff] %vm39_vm0, %v204_v35  ;;  %228 = vst.msk [vmem:[%s496_s4 + $0x18] sm:$0xff] %vm39_vm0, %v204_v35  ;;  %v203_v41 = vmax.f32 %v153_v37, 0.0  ;;  %v209_v42 = vmax.f32 %v183_v38, 0.0  ;;  %v168_v43 = vadd.f32 %v290_v39, %v245_v16  ;;  %v198_v44 = vadd.f32 %v299_v40, %v245_v16 }
  0xd5   :  { %222 = vst.msk [vmem:[%s495_s3 + $0x48] sm:$0xff] %vm39_vm0, %v210_v36  ;;  %234 = vst.msk [vmem:[%s496_s4 + $0x48] sm:$0xff] %vm39_vm0, %v210_v36  ;;  %v162_v45 = vpop.f32.mrf.mxu0  ;;  %v192_v46 = vpop.f32.mrf.mxu1 }
  0xd6   :  { %215 = vst.msk [vmem:[%s495_s3 + $0x10] sm:$0xff] %vm39_vm0, %v203_v41  ;;  %227 = vst.msk [vmem:[%s496_s4 + $0x10] sm:$0xff] %vm39_vm0, %v203_v41  ;;  %v206_v47 = vmax.f32 %v168_v43, 0.0  ;;  %v212_v48 = vmax.f32 %v198_v44, 0.0  ;;  %v163_v49 = vadd.f32 %v245_v16, %v162_v45  ;;  %v193_v50 = vadd.f32 %v245_v16, %v192_v46 }
  0xd7   :  { %221 = vst.msk [vmem:[%s495_s3 + $0x40] sm:$0xff] %vm39_vm0, %v209_v42  ;;  %233 = vst.msk [vmem:[%s496_s4 + $0x40] sm:$0xff] %vm39_vm0, %v209_v42 }
  0xd8   :  { %218 = vst.msk [vmem:[%s495_s3 + $0x28] sm:$0xff] %vm39_vm0, %v206_v47  ;;  %230 = vst.msk [vmem:[%s496_s4 + $0x28] sm:$0xff] %vm39_vm0, %v206_v47  ;;  %v205_v51 = vmax.f32 %v163_v49, 0.0  ;;  %v211_v52 = vmax.f32 %v193_v50, 0.0 }
  0xd9   :  { %224 = vst.msk [vmem:[%s495_s3 + $0x58] sm:$0xff] %vm39_vm0, %v212_v48  ;;  %236 = vst.msk [vmem:[%s496_s4 + $0x58] sm:$0xff] %vm39_vm0, %v212_v48 }
  0xda   :  { %217 = vst.msk [vmem:[%s495_s3 + $0x20] sm:$0xff] %vm39_vm0, %v205_v51  ;;  %229 = vst.msk [vmem:[%s496_s4 + $0x20] sm:$0xff] %vm39_vm0, %v205_v51 }
  0xdb   :  { %223 = vst.msk [vmem:[%s495_s3 + $0x50] sm:$0xff] %vm39_vm0, %v211_v52  ;;  %235 = vst.msk [vmem:[%s496_s4 + $0x50] sm:$0xff] %vm39_vm0, %v211_v52 }

</bundles_post_ra>
